<compile_context>
chip_gen: v7x
topology: tpu7x:2x2x1
jax: 0.10.0
libtpu: 0.0.40
codegen_flags: <defaults>
</compile_context>

<pallas_src>
import jax
import jax.numpy as jnp
from jax.experimental import pallas as pl
from jax.experimental.pallas import tpu as pltpu

LANE = 128  # TPU lane width


def _round_up(n, m):
    return ((n + m - 1) // m) * m


def mlp_kernel(x_ref, w1_ref, b1_ref, w2_ref, b2_ref, o_ref):
    x = x_ref[...]                                                   # [TB, 784]
    h = jnp.dot(x, w1_ref[...], preferred_element_type=jnp.float32)  # [TB, 128]
    h = jnp.maximum(h + b1_ref[...], 0.0)                            # bias + ReLU
    y = jnp.dot(h, w2_ref[...], preferred_element_type=jnp.float32)  # [TB, 128]
    y = y + b2_ref[...]
    n = o_ref.shape[-1]                                              # 10 real lanes
    o_ref[...] = jax.nn.sigmoid(y[:, :n]).astype(o_ref.dtype)        # Sigmoid


def prepare_params(w1, b1, w2, b2, *, stream_dtype=jnp.float32):
    """Transpose + lane-pad the PyTorch-convention ([out, in]) weights once.

    Zero-padded b1 columns / w2t rows are inert (b1 pad = 0, ReLU(0) = 0, zero
    rows of w2t contribute nothing); padded output lanes are never stored.
    `stream_dtype` controls the dtype of the bandwidth-dominant x/w1 stream.
    """
    H, K = w1.shape          # 20, 784
    N = w2.shape[0]          # 10
    H_pad = _round_up(H, LANE)
    N_pad = _round_up(N, LANE)
    w1t = jnp.zeros((K, H_pad), stream_dtype).at[:, :H].set(w1.T.astype(stream_dtype))
    b1r = jnp.zeros((1, H_pad), jnp.float32).at[:, :H].set(b1.astype(jnp.float32))
    w2t = jnp.zeros((H_pad, N_pad), jnp.float32).at[:H, :N].set(w2.T.astype(jnp.float32))
    b2r = jnp.zeros((1, N_pad), jnp.float32).at[:, :N].set(b2.astype(jnp.float32))
    return w1t, b1r, w2t, b2r, N


def mlp_forward(x, params, *, block_b=2048):
    """x: [B, 784] -> [B, 10].  `params` comes from prepare_params()."""
    w1t, b1r, w2t, b2r, N = params
    B, K = x.shape
    H_pad = w1t.shape[1]
    N_pad = w2t.shape[1]

    # Match the streaming dtype of w1t (no-op in the default f32 path).
    x = x.astype(w1t.dtype)

    # Batch tiling: tile must be a sublane multiple (8); partial boundary
    # blocks are read-padded / write-masked by Pallas, so B need not divide.
    TB = min(block_b, _round_up(B, 8))
    grid = (pl.cdiv(B, TB),)

    itemsize = x.dtype.itemsize
    cost = pl.CostEstimate(
        flops=2 * B * (K * H_pad + H_pad * N_pad),
        transcendentals=B * N_pad,
        bytes_accessed=(B * K * itemsize + B * N * 4
                        + w1t.size * w1t.dtype.itemsize
                        + w2t.size * 4 + b1r.size * 4 + b2r.size * 4),
    )

    out = pl.pallas_call(
        mlp_kernel,
        out_shape=jax.ShapeDtypeStruct((B, N), jnp.float32),
        grid=grid,
        in_specs=[
            pl.BlockSpec((TB, K), lambda i: (i, 0)),        # streamed x tiles
            pl.BlockSpec((K, H_pad), lambda i: (0, 0)),     # resident weights
            pl.BlockSpec((1, H_pad), lambda i: (0, 0)),
            pl.BlockSpec((H_pad, N_pad), lambda i: (0, 0)),
            pl.BlockSpec((1, N_pad), lambda i: (0, 0)),
        ],
        out_specs=pl.BlockSpec((TB, N), lambda i: (i, 0)),  # narrow [B,10] writeback
        compiler_params=pltpu.CompilerParams(
            dimension_semantics=("parallel",),   # megacore sharding on v7x
            vmem_limit_bytes=28 << 20,           # covers TB=2048 under v5e's 16 MiB default
        ),
        cost_estimate=cost,
    )(x, w1t, b1r, w2t, b2r)

    return out


def init_params(key):
    """Deterministic init mimicking PyTorch nn.Linear default (uniform +-1/sqrt(fan_in))."""
    k1, k2, k3, k4 = jax.random.split(key, 4)
    bound1 = 1.0 / jnp.sqrt(784.0)
    bound2 = 1.0 / jnp.sqrt(20.0)
    w1 = jax.random.uniform(k1, (20, 784), jnp.float32, -bound1, bound1)
    b1 = jax.random.uniform(k2, (20,),     jnp.float32, -bound1, bound1)
    w2 = jax.random.uniform(k3, (10, 20),  jnp.float32, -bound2, bound2)
    b2 = jax.random.uniform(k4, (10,),     jnp.float32, -bound2, bound2)
    return w1, b1, w2, b2


def _ref(x, w1, b1, w2, b2):
    return jax.nn.sigmoid(jnp.maximum(x @ w1.T + b1, 0.0) @ w2.T + b2)


if __name__ == "__main__":
    key = jax.random.PRNGKey(0)
    kx, kp = jax.random.split(key)
    w1, b1, w2, b2 = init_params(kp)

    # ---- f32 path: matches the PyTorch/f32 reference to 1e-5. -------------
    params_f32 = prepare_params(w1, b1, w2, b2, stream_dtype=jnp.float32)
    for B in (8, 50):  # tile-divisible and ragged batch sizes (boundary-block path)
        x = jax.random.normal(jax.random.fold_in(kx, B), (B, 784), jnp.float32)
        out = jax.block_until_ready(mlp_forward(x, params_f32))
        assert out.shape == (B, 10)
        assert jnp.allclose(out, _ref(x, w1, b1, w2, b2), atol=1e-5, rtol=1e-5)

    # ---- bf16-streamed path: halves the dominant HBM read stream. ---------
    params_bf16 = prepare_params(w1, b1, w2, b2, stream_dtype=jnp.bfloat16)
    xb = jax.random.normal(kx, (64, 784), jnp.float32)
    out_bf16 = jax.block_until_ready(mlp_forward(xb, params_bf16))
    assert out_bf16.shape == (64, 10)
    assert jnp.allclose(out_bf16, _ref(xb, w1, b1, w2, b2), atol=5e-2)

    print("KERNEL_OK")
</pallas_src>

<mosaic_0001>
module attributes {stable_mosaic.version = 11 : i64} {
  func.func @mlp_kernel(%arg0: i32, %arg1: memref<8x784xf32, #tpu.memory_space<vmem>>, %arg2: memref<784x128xf32, #tpu.memory_space<vmem>>, %arg3: memref<1x128xf32, #tpu.memory_space<vmem>>, %arg4: memref<128x128xf32, #tpu.memory_space<vmem>>, %arg5: memref<1x128xf32, #tpu.memory_space<vmem>>, %arg6: memref<8x10xf32, #tpu.memory_space<vmem>>) attributes {dimension_semantics = [#tpu.dimension_semantics<parallel>], iteration_bounds = array<i64: 1>, scalar_prefetch = 0 : i64, scratch_operands = 0 : i64, tpu.core_type = #tpu.core_type<tc>, window_params = [{transform_indices = @transform_0, window_bounds = array<i64: 8, 784>}, {pipeline_mode = #tpu.pipeline_mode<synchronous>, transform_indices = @transform_1, window_bounds = array<i64: 784, 128>}, {pipeline_mode = #tpu.pipeline_mode<synchronous>, transform_indices = @transform_2, window_bounds = array<i64: 1, 128>}, {pipeline_mode = #tpu.pipeline_mode<synchronous>, transform_indices = @transform_3, window_bounds = array<i64: 128, 128>}, {pipeline_mode = #tpu.pipeline_mode<synchronous>, transform_indices = @transform_4, window_bounds = array<i64: 1, 128>}, {transform_indices = @transform_5, window_bounds = array<i64: 8, 10>}]} {
    %c0 = arith.constant 0 : index
    %c0_0 = arith.constant 0 : index
    %0 = vector.load %arg1[%c0, %c0_0] : memref<8x784xf32, #tpu.memory_space<vmem>>, vector<8x784xf32>
    %c0_1 = arith.constant 0 : index
    %c0_2 = arith.constant 0 : index
    %1 = vector.load %arg2[%c0_1, %c0_2] : memref<784x128xf32, #tpu.memory_space<vmem>>, vector<784x128xf32>
    %cst = arith.constant dense<0.000000e+00> : vector<8x128xf32>
    %2 = tpu.matmul %0, %1, %cst {dimension_numbers = #tpu.dot_dimension_numbers<[1], [0], [0], [1], [0, 0, 1, 1], [], []>} : vector<8x784xf32>, vector<784x128xf32>, vector<8x128xf32> -> vector<8x128xf32>
    %c0_3 = arith.constant 0 : index
    %c0_4 = arith.constant 0 : index
    %3 = vector.load %arg3[%c0_3, %c0_4] : memref<1x128xf32, #tpu.memory_space<vmem>>, vector<1x128xf32>
    %4 = vector.broadcast %3 : vector<1x128xf32> to vector<8x128xf32>
    %5 = arith.addf %2, %4 : vector<8x128xf32>
    %cst_5 = arith.constant 0.000000e+00 : f32
    %6 = vector.broadcast %cst_5 : f32 to vector<8x128xf32>
    %7 = arith.maximumf %5, %6 : vector<8x128xf32>
    %c0_6 = arith.constant 0 : index
    %c0_7 = arith.constant 0 : index
    %8 = vector.load %arg4[%c0_6, %c0_7] : memref<128x128xf32, #tpu.memory_space<vmem>>, vector<128x128xf32>
    %cst_8 = arith.constant dense<0.000000e+00> : vector<8x128xf32>
    %9 = tpu.matmul %7, %8, %cst_8 {dimension_numbers = #tpu.dot_dimension_numbers<[1], [0], [0], [1], [0, 0, 1, 1], [], []>} : vector<8x128xf32>, vector<128x128xf32>, vector<8x128xf32> -> vector<8x128xf32>
    %c0_9 = arith.constant 0 : index
    %c0_10 = arith.constant 0 : index
    %10 = vector.load %arg5[%c0_9, %c0_10] : memref<1x128xf32, #tpu.memory_space<vmem>>, vector<1x128xf32>
    %11 = vector.broadcast %10 : vector<1x128xf32> to vector<8x128xf32>
    %12 = arith.addf %9, %11 : vector<8x128xf32>
    %13 = vector.extract_strided_slice %12 {offsets = [0, 0], sizes = [8, 10], strides = [1, 1]} : vector<8x128xf32> to vector<8x10xf32>
    %14 = arith.negf %13 : vector<8x10xf32>
    %15 = math.exp %14 : vector<8x10xf32>
    %cst_11 = arith.constant 1.000000e+00 : f32
    %16 = vector.broadcast %cst_11 : f32 to vector<8x10xf32>
    %17 = arith.addf %16, %15 : vector<8x10xf32>
    %18 = arith.divf %16, %17 : vector<8x10xf32>
    %c0_12 = arith.constant 0 : index
    %c0_13 = arith.constant 0 : index
    %19 = vector.load %arg6[%c0_12, %c0_13] : memref<8x10xf32, #tpu.memory_space<vmem>>, vector<8x10xf32>
    tpu.vector_store %arg6[%c0_12, %c0_13], %18 {strides = array<i32>} : memref<8x10xf32, #tpu.memory_space<vmem>>, vector<8x10xf32>,
    return
  }
  func.func @transform_0(%arg0: i32) -> (i32, i32) {
    %c0_i32 = arith.constant 0 : i32
    %c0_i32_0 = arith.constant 0 : i32
    return %arg0, %c0_i32 : i32, i32
  }
  func.func @transform_1(%arg0: i32) -> (i32, i32) {
    %c0_i32 = arith.constant 0 : i32
    %c0_i32_0 = arith.constant 0 : i32
    %c0_i32_1 = arith.constant 0 : i32
    return %c0_i32, %c0_i32_0 : i32, i32
  }
  func.func @transform_2(%arg0: i32) -> (i32, i32) {
    %c0_i32 = arith.constant 0 : i32
    %c0_i32_0 = arith.constant 0 : i32
    %c0_i32_1 = arith.constant 0 : i32
    return %c0_i32, %c0_i32_0 : i32, i32
  }
  func.func @transform_3(%arg0: i32) -> (i32, i32) {
    %c0_i32 = arith.constant 0 : i32
    %c0_i32_0 = arith.constant 0 : i32
    %c0_i32_1 = arith.constant 0 : i32
    return %c0_i32, %c0_i32_0 : i32, i32
  }
  func.func @transform_4(%arg0: i32) -> (i32, i32) {
    %c0_i32 = arith.constant 0 : i32
    %c0_i32_0 = arith.constant 0 : i32
    %c0_i32_1 = arith.constant 0 : i32
    return %c0_i32, %c0_i32_0 : i32, i32
  }
  func.func @transform_5(%arg0: i32) -> (i32, i32) {
    %c0_i32 = arith.constant 0 : i32
    %c0_i32_0 = arith.constant 0 : i32
    return %arg0, %c0_i32 : i32, i32
  }
}

</mosaic_0001>

<bundles_post_ra>
// kernel: tpu_custom_call.1
= control target key start
LH: loop header
LB: loop body
LE: loop exit
PB: predicated region body
PF: predicated region fallthrough
CT: control target
= control target key end

     0   :  { %10 = vsyncpa [#allocation3], 0  ;;  %s1083_s0 = inlined_call_operand.hbm [shape: f32[8,784], index: 0, kind: input, shape index: {}]   ;;  %s1084_s1 = inlined_call_operand.hbm [shape: f32[784,128], index: 1, kind: input, shape index: {}]   ;;  %s1085_s2 = inlined_call_operand.vmem [shape: f32[1,128], index: 2, kind: input, shape index: {}]   ;;  %s1086_s3 = inlined_call_operand.hbm [shape: f32[128,128], index: 3, kind: input, shape index: {}]   ;;  %s1087_s4 = inlined_call_operand.vmem [shape: f32[1,128], index: 4, kind: input, shape index: {}]   ;;  %s1088_s5 = inlined_call_operand.hbm [shape: f32[8,10], index: 5, kind: output, shape index: {}]  }
   0x1   :  { %11 = vsyncpa [#allocation6], 0 }
   0x2   :  { %12 = vsyncpa [#allocation4], 0  ;;  %s975_s18 = smov [#allocation5]   ;;  %s881_s22 = scalar_lea.hbm %s1084_s1, 12544 }
   0x3   :  { %s28_s19 = sshll.u32 %s975_s18, 4  ;;  %p882_p0 = scmp.ne.s32.totalorder %s1084_s1, %s881_s22  ;;  %s29_s19 = int_to_ptr.vmem [resolvable:$true] %s28_s19 }
   0x4   :  { %p885_p1 = scmp.lt.u32.totalorder %s881_s22, %s1084_s1 }
   0x6   :  { %p887_p2 = pnand %p885_p1, %p882_p0 }
   0x8   :  { %890 = shalt.err (!%p887_p2)
}
   0x9   :  { %s891_s27 = scalar_lea.vmem %s29_s19, 12544  ;;  %p896_p4 = scmp.lt.s32.totalorder %s29_s19, %s29_s19 }
   0xa   :  { %p892_p3 = scmp.ne.s32.totalorder %s29_s19, %s891_s27  ;;  %p897_p5 = scmp.lt.s32.totalorder %s891_s27, %s891_s27 }
   0xc   :  { %p898_p6 = por %p897_p5, %p896_p4 }
   0xe   :  { %p899_p7 = pnand %p898_p6, %p892_p3 }
  0x10   :  { %902 = shalt.err (!%p899_p7)
}
  0x11   :  { %s976_s28 = smov 128   ;;  %s977_s29 = smov 8  }
  0x12   :  { %34 = dma.hbm_to_vmem [thread:$0]  %s1084_s1, 12544, %s29_s19, [#allocation6], %s976_s28, %s976_s28, %s977_s29  }
  0x13   :  { %s978_s7 = smov [#allocation2]   ;;  %s979_s9 = smov [#allocation7]  }
  0x14   :  { %s19_s8 = sshll.u32 %s978_s7, 4  ;;  %s42_s10 = sshll.u32 %s979_s9, 4  ;;  %s20_s8 = int_to_ptr.vmem [resolvable:$true] %s19_s8  ;;  %s43_s10 = int_to_ptr.vmem [resolvable:$true] %s42_s10 }
  0x15   :  { %s903_s13 = scalar_lea.hbm %s1083_s0, 896 }
  0x16   :  { %p904_p8 = scmp.ne.s32.totalorder %s1083_s0, %s903_s13  ;;  %p907_p9 = scmp.lt.u32.totalorder %s903_s13, %s1083_s0 }
  0x18   :  { %p909_p10 = pnand %p907_p9, %p904_p8 }
  0x1a   :  { %912 = shalt.err (!%p909_p10)
}
  0x1b   :  { %s913_s1 = scalar_lea.vmem %s20_s8, 896  ;;  %p918_p12 = scmp.lt.s32.totalorder %s20_s8, %s20_s8 }
  0x1c   :  { %p914_p11 = scmp.ne.s32.totalorder %s20_s8, %s913_s1  ;;  %p919_p13 = scmp.lt.s32.totalorder %s913_s1, %s913_s1 }
  0x1e   :  { %p920_p0 = por %p919_p13, %p918_p12 }
  0x20   :  { %p921_p1 = pnand %p920_p0, %p914_p11 }
  0x22   :  { %924 = shalt.err (!%p921_p1)
}
  0x23   :  { %22 = dma.hbm_to_vmem [thread:$0]  %s1083_s0, 896, %s20_s8, [#allocation3]  }
  0x24   :  { %s925_s22 = scalar_lea.hbm %s1086_s3, 2048 }
  0x25   :  { %p926_p2 = scmp.ne.s32.totalorder %s1086_s3, %s925_s22  ;;  %p929_p3 = scmp.lt.u32.totalorder %s925_s22, %s1086_s3 }
  0x27   :  { %p931_p4 = pnand %p929_p3, %p926_p2 }
  0x29   :  { %934 = shalt.err (!%p931_p4)
}
  0x2a   :  { %s935_s27 = scalar_lea.vmem %s43_s10, 2048  ;;  %p940_p6 = scmp.lt.s32.totalorder %s43_s10, %s43_s10 }
  0x2b   :  { %p936_p5 = scmp.ne.s32.totalorder %s43_s10, %s935_s27  ;;  %p941_p7 = scmp.lt.s32.totalorder %s935_s27, %s935_s27 }
  0x2d   :  { %p942_p8 = por %p941_p7, %p940_p6 }
  0x2f   :  { %p943_p9 = pnand %p942_p8, %p936_p5 }
  0x31   :  { %946 = shalt.err (!%p943_p9)
}
  0x32   :  { %48 = dma.hbm_to_vmem [thread:$0]  %s1086_s3, 2048, %s43_s10, [#allocation6], %s976_s28, %s976_s28, %s977_s29  }
  0x33   :  { %969 = dma.done.wait [#allocation3], 896  }
  0x34   :  { %970 = vsyncadd [#allocation3], 4294966400 }
  0x35   :  { %971 = dma.done.wait [#allocation6], 14592  }
  0x36   :  { %972 = vsyncadd [#allocation6], 4294952704  ;;  %v83_v0 = vld [vmem:[#allocation5 + $0x80] sm:$0xff]  ;;  %v84_v1 = vld [vmem:[#allocation5 + $0x88] sm:$0xff]  ;;  %vm981_vm0 = vmmov 0   ;;  %vm172_vm1 = vcmask 130048  }
  0x37   :  { %v67_v2 = vld [vmem:[#allocation5] sm:$0xff]  ;;  %v745_v3 = vpack.c.bf16 %v84_v1, %v83_v0  ;;  %v68_v4 = vld [vmem:[#allocation5 + $0x8] sm:$0xff]  ;;  %v85_v11 = vld [vmem:[#allocation5 + $0x90] sm:$0xff]  ;;  %vm556_vm2 = vcmask 80896  }
  0x38   :  { %v115_v5 = vld [vmem:[#allocation5 + $0x180] sm:$0xff]  ;;  %v116_v6 = vld [vmem:[#allocation5 + $0x188] sm:$0xff]  ;;  %v747_v7 = vpack.c.bf16 %v68_v4, %v67_v2  ;;  %v86_v13 = vld [vmem:[#allocation5 + $0x98] sm:$0xff] }
  0x39   :  { %v777_v8 = vpack.c.bf16 %v116_v6, %v115_v5  ;;  %v99_v9 = vld [vmem:[#allocation5 + $0x100] sm:$0xff]  ;;  %v100_v10 = vld [vmem:[#allocation5 + $0x108] sm:$0xff]  ;;  %746 = vmatprep.subr.bf16.mxu0 %v745_v3  ;;  %v69_v14 = vld [vmem:[#allocation5 + $0x10] sm:$0xff]  ;;  %v749_v16 = vpack.c.bf16 %v86_v13, %v85_v11 }
  0x3a   :  { %v779_v12 = vpack.c.bf16 %v100_v10, %v99_v9  ;;  %v70_v15 = vld [vmem:[#allocation5 + $0x18] sm:$0xff]  ;;  %748 = vmatpush3.bf16.msra.mxu0 %v747_v7  ;;  %v117_v18 = vld [vmem:[#allocation5 + $0x190] sm:$0xff]  ;;  %v87_v23 = vld [vmem:[#allocation5 + $0xa0] sm:$0xff] }
  0x3b   :  { %778 = vmatprep.subr.bf16.mxu1 %v777_v8  ;;  %v751_v17 = vpack.c.bf16 %v70_v15, %v69_v14  ;;  %v118_v19 = vld [vmem:[#allocation5 + $0x198] sm:$0xff]  ;;  %v101_v20 = vld [vmem:[#allocation5 + $0x110] sm:$0xff]  ;;  %v88_v24 = vld [vmem:[#allocation5 + $0xa8] sm:$0xff]  ;;  %750 = vmatprep.subr.bf16.mxu0 %v749_v16 }
  0x3c   :  { %780 = vmatpush3.bf16.msra.mxu1 %v779_v12  ;;  %v781_v21 = vpack.c.bf16 %v118_v19, %v117_v18  ;;  %v102_v22 = vld [vmem:[#allocation5 + $0x118] sm:$0xff]  ;;  %v753_v26 = vpack.c.bf16 %v88_v24, %v87_v23  ;;  %v71_v27 = vld [vmem:[#allocation5 + $0x20] sm:$0xff]  ;;  %v72_v28 = vld [vmem:[#allocation5 + $0x28] sm:$0xff] }
  0x3d   :  { %v783_v25 = vpack.c.bf16 %v102_v22, %v101_v20  ;;  %v119_v29 = vld [vmem:[#allocation5 + $0x1a0] sm:$0xff]  ;;  %v120_v30 = vld [vmem:[#allocation5 + $0x1a8] sm:$0xff]  ;;  %v755_v33 = vpack.c.bf16 %v72_v28, %v71_v27  ;;  %v89_v35 = vld [vmem:[#allocation5 + $0xb0] sm:$0xff] }
  0x3e   :  { %782 = vmatprep.subr.bf16.mxu1 %v781_v21  ;;  %v103_v31 = vld [vmem:[#allocation5 + $0x120] sm:$0xff]  ;;  %v104_v32 = vld [vmem:[#allocation5 + $0x128] sm:$0xff]  ;;  %752 = vmatpush3.bf16.msra.mxu0 %v751_v17  ;;  %v785_v34 = vpack.c.bf16 %v120_v30, %v119_v29  ;;  %v90_v36 = vld [vmem:[#allocation5 + $0xb8] sm:$0xff] }
  0x3f   :  { %v73_v37 = vld [vmem:[#allocation5 + $0x30] sm:$0xff]  ;;  %754 = vmatprep.subr.bf16.mxu0 %v753_v26  ;;  %v787_v38 = vpack.c.bf16 %v104_v32, %v103_v31  ;;  %v757_v39 = vpack.c.bf16 %v90_v36, %v89_v35  ;;  %v74_v40 = vld [vmem:[#allocation5 + $0x38] sm:$0xff]  ;;  %v91_v46 = vld [vmem:[#allocation5 + $0xc0] sm:$0xff] }
  0x40   :  { %784 = vmatpush3.bf16.msra.mxu1 %v783_v25  ;;  %v121_v41 = vld [vmem:[#allocation5 + $0x1b0] sm:$0xff]  ;;  %v122_v42 = vld [vmem:[#allocation5 + $0x1b8] sm:$0xff]  ;;  %v92_v47 = vld [vmem:[#allocation5 + $0xc8] sm:$0xff]  ;;  %v759_v48 = vpack.c.bf16 %v74_v40, %v73_v37 }
  0x41   :  { %786 = vmatprep.subr.bf16.mxu1 %v785_v34  ;;  %v789_v43 = vpack.c.bf16 %v122_v42, %v121_v41  ;;  %v105_v44 = vld [vmem:[#allocation5 + $0x130] sm:$0xff]  ;;  %v106_v45 = vld [vmem:[#allocation5 + $0x138] sm:$0xff]  ;;  %v123_v49 = vld [vmem:[#allocation5 + $0x1c0] sm:$0xff]  ;;  %v761_v52 = vpack.c.bf16 %v92_v47, %v91_v46 }
  0x42   :  { %756 = vmatpush3.bf16.msra.mxu0 %v755_v33  ;;  %v124_v50 = vld [vmem:[#allocation5 + $0x1c8] sm:$0xff]  ;;  %v791_v51 = vpack.c.bf16 %v106_v45, %v105_v44  ;;  %v75_v53 = vld [vmem:[#allocation5 + $0x40] sm:$0xff]  ;;  %v93_v58 = vld [vmem:[#allocation5 + $0xd0] sm:$0xff] }
  0x43   :  { %758 = vmatprep.subr.bf16.mxu0 %v757_v39  ;;  %v76_v54 = vld [vmem:[#allocation5 + $0x48] sm:$0xff]  ;;  %v107_v55 = vld [vmem:[#allocation5 + $0x140] sm:$0xff]  ;;  %v793_v56 = vpack.c.bf16 %v124_v50, %v123_v49  ;;  %v94_v59 = vld [vmem:[#allocation5 + $0xd8] sm:$0xff]  ;;  %v980_v50 = vmov 0.0|0.0  }
  0x44   :  { %788 = vmatpush3.bf16.msra.mxu1 %v787_v38  ;;  %v108_v57 = vld [vmem:[#allocation5 + $0x148] sm:$0xff]  ;;  %v125_v60 = vld [vmem:[#allocation5 + $0x1d0] sm:$0xff]  ;;  %v126_v61 = vld [vmem:[#allocation5 + $0x1d8] sm:$0xff]  ;;  %v763_v62 = vpack.c.bf16 %v76_v54, %v75_v53  ;;  %v765_v0 = vpack.c.bf16 %v94_v59, %v93_v58 }
  0x45   :  { %790 = vmatprep.subr.bf16.mxu1 %v789_v43  ;;  %v795_v63 = vpack.c.bf16 %v108_v57, %v107_v55  ;;  %v77_v1 = vld [vmem:[#allocation5 + $0x50] sm:$0xff]  ;;  %v78_v2 = vld [vmem:[#allocation5 + $0x58] sm:$0xff]  ;;  %v797_v4 = vpack.c.bf16 %v126_v61, %v125_v60  ;;  %v95_v6 = vld [vmem:[#allocation5 + $0xe0] sm:$0xff]  ;;  %v982_v60 = vmov 0.0  }
  0x46   :  { %760 = vmatpush3.bf16.msra.mxu0 %v759_v48  ;;  %v109_v3 = vld [vmem:[#allocation5 + $0x150] sm:$0xff]  ;;  %v110_v5 = vld [vmem:[#allocation5 + $0x158] sm:$0xff]  ;;  %v96_v7 = vld [vmem:[#allocation5 + $0xe8] sm:$0xff]  ;;  %v767_v10 = vpack.c.bf16 %v78_v2, %v77_v1 }
  0x47   :  { %762 = vmatprep.subr.bf16.mxu0 %v761_v52  ;;  %v127_v8 = vld [vmem:[#allocation5 + $0x1e0] sm:$0xff]  ;;  %v128_v9 = vld [vmem:[#allocation5 + $0x1e8] sm:$0xff]  ;;  %v61_v12 = vld [vmem:[#allocation2 + $0x8] sm:$0xff]  ;;  %v799_v13 = vpack.c.bf16 %v110_v5, %v109_v3  ;;  %v769_v14 = vpack.c.bf16 %v96_v7, %v95_v6 }
  0x48   :  { %792 = vmatpush3.bf16.msra.mxu1 %v791_v51  ;;  %v79_v11 = vld [vmem:[#allocation5 + $0x60] sm:$0xff]  ;;  %v80_v15 = vld [vmem:[#allocation5 + $0x68] sm:$0xff]  ;;  %v801_v18 = vpack.c.bf16 %v128_v9, %v127_v8  ;;  %v97_v19 = vld [vmem:[#allocation5 + $0xf0] sm:$0xff]  ;;  %240 = vmatprep.mubr.f32.mxu0 %v61_v12 }
  0x49   :  { %794 = vmatprep.subr.bf16.mxu1 %v793_v56  ;;  %v111_v16 = vld [vmem:[#allocation5 + $0x160] sm:$0xff]  ;;  %v112_v17 = vld [vmem:[#allocation5 + $0x168] sm:$0xff]  ;;  %v98_v20 = vld [vmem:[#allocation5 + $0xf8] sm:$0xff]  ;;  %v771_v24 = vpack.c.bf16 %v80_v15, %v79_v11 }
  0x4a   :  { %764 = vmatpush3.bf16.msra.mxu0 %v763_v62  ;;  %v63_v21 = vld [vmem:[#allocation2 + $0x18] sm:$0xff]  ;;  %v129_v22 = vld [vmem:[#allocation5 + $0x1f0] sm:$0xff]  ;;  %v130_v23 = vld [vmem:[#allocation5 + $0x1f8] sm:$0xff]  ;;  %v803_v25 = vpack.c.bf16 %v112_v17, %v111_v16  ;;  %v773_v26 = vpack.c.bf16 %v98_v20, %v97_v19 }
  0x4b   :  { %766 = vmatprep.subr.bf16.mxu0 %v765_v0  ;;  %310 = vmatprep.mubr.f32.mxu1 %v63_v21  ;;  %v81_v27 = vld [vmem:[#allocation5 + $0x70] sm:$0xff]  ;;  %v82_v28 = vld [vmem:[#allocation5 + $0x78] sm:$0xff]  ;;  %v805_v30 = vpack.c.bf16 %v130_v23, %v129_v22  ;;  %v147_v32 = vld [vmem:[#allocation5 + $0x280] sm:$0xff] }
  0x4c   :  { %796 = vmatpush3.bf16.msra.mxu1 %v795_v63  ;;  %v113_v29 = vld [vmem:[#allocation5 + $0x170] sm:$0xff]  ;;  %v114_v31 = vld [vmem:[#allocation5 + $0x178] sm:$0xff]  ;;  %v148_v33 = vld [vmem:[#allocation5 + $0x288] sm:$0xff]  ;;  %v775_v34 = vpack.c.bf16 %v82_v28, %v81_v27 }
  0x4d   :  { %798 = vmatprep.subr.bf16.mxu1 %v797_v4  ;;  %v807_v35 = vpack.c.bf16 %v114_v31, %v113_v29  ;;  %v809_v36 = vpack.c.bf16 %v148_v33, %v147_v32  ;;  %v131_v37 = vld [vmem:[#allocation5 + $0x200] sm:$0xff]  ;;  %v132_v38 = vld [vmem:[#allocation5 + $0x208] sm:$0xff]  ;;  %v149_v39 = vld [vmem:[#allocation5 + $0x290] sm:$0xff] }
  0x4e   :  { %768 = vmatpush3.bf16.msra.mxu0 %v767_v10  ;;  %v150_v40 = vld [vmem:[#allocation5 + $0x298] sm:$0xff]  ;;  %v60_v41 = vld [vmem:[#allocation2] sm:$0xff]  ;;  %v811_v42 = vpack.c.bf16 %v132_v38, %v131_v37  ;;  %v133_v44 = vld [vmem:[#allocation5 + $0x210] sm:$0xff] }
  0x4f   :  { %770 = vmatprep.subr.bf16.mxu0 %v769_v14  ;;  %v62_v43 = vld [vmem:[#allocation2 + $0x10] sm:$0xff]  ;;  %v813_v45 = vpack.c.bf16 %v150_v40, %v149_v39  ;;  %v151_v47 = vld [vmem:[#allocation5 + $0x2a0] sm:$0xff]  ;;  %v152_v48 = vld [vmem:[#allocation5 + $0x2a8] sm:$0xff] }
  0x50   :  { %800 = vmatpush3.bf16.msra.mxu1 %v799_v13  ;;  %v134_v46 = vld [vmem:[#allocation5 + $0x218] sm:$0xff]  ;;  %v65_v49 = vld [vmem:[#allocation2 + $0x28] sm:$0xff]  ;;  %v163_v51 = vld [vmem:[#allocation5 + $0x300] sm:$0xff]  ;;  %v817_v55 = vpack.c.bf16 %v152_v48, %v151_v47 }
  0x51   :  { %802 = vmatprep.subr.bf16.mxu1 %v801_v18  ;;  %v164_v52 = vld [vmem:[#allocation5 + $0x308] sm:$0xff]  ;;  %v815_v54 = vpack.c.bf16 %v134_v46, %v133_v44  ;;  %v135_v56 = vld [vmem:[#allocation5 + $0x220] sm:$0xff]  ;;  %v153_v58 = vld [vmem:[#allocation5 + $0x2b0] sm:$0xff] }
  0x52   :  { %772 = vmatpush3.bf16.msra.mxu0 %v771_v24  ;;  %v842_v53 = vpack.c.bf16 %v164_v52, %v163_v51  ;;  %v136_v57 = vld [vmem:[#allocation5 + $0x228] sm:$0xff]  ;;  %v154_v59 = vld [vmem:[#allocation5 + $0x2b8] sm:$0xff]  ;;  %v137_v0 = vld [vmem:[#allocation5 + $0x230] sm:$0xff] }
  0x53   :  { %774 = vmatprep.subr.bf16.mxu0 %v773_v26  ;;  %v66_v61 = vld [vmem:[#allocation2 + $0x30] sm:$0xff]  ;;  %v819_v62 = vpack.c.bf16 %v136_v57, %v135_v56  ;;  %v821_v63 = vpack.c.bf16 %v154_v59, %v153_v58  ;;  %v155_v2 = vld [vmem:[#allocation5 + $0x2c0] sm:$0xff]  ;;  %v156_v3 = vld [vmem:[#allocation5 + $0x2c8] sm:$0xff] }
  0x54   :  { %804 = vmatpush3.bf16.msra.mxu1 %v803_v25  ;;  %v138_v1 = vld [vmem:[#allocation5 + $0x238] sm:$0xff]  ;;  %v825_v5 = vpack.c.bf16 %v156_v3, %v155_v2  ;;  %v139_v6 = vld [vmem:[#allocation5 + $0x240] sm:$0xff]  ;;  %v140_v7 = vld [vmem:[#allocation5 + $0x248] sm:$0xff] }
  0x55   :  { %806 = vmatprep.subr.bf16.mxu1 %v805_v30  ;;  %v823_v4 = vpack.c.bf16 %v138_v1, %v137_v0  ;;  %v157_v8 = vld [vmem:[#allocation5 + $0x2d0] sm:$0xff]  ;;  %v158_v9 = vld [vmem:[#allocation5 + $0x2d8] sm:$0xff]  ;;  %v827_v10 = vpack.c.bf16 %v140_v7, %v139_v6  ;;  %v159_v14 = vld [vmem:[#allocation5 + $0x2e0] sm:$0xff] }
  0x56   :  { %776 = vmatpush3.bf16.msra.mxu0 %v775_v34  ;;  %v829_v11 = vpack.c.bf16 %v158_v9, %v157_v8  ;;  %v141_v12 = vld [vmem:[#allocation5 + $0x250] sm:$0xff]  ;;  %v142_v13 = vld [vmem:[#allocation5 + $0x258] sm:$0xff]  ;;  %v160_v15 = vld [vmem:[#allocation5 + $0x2e8] sm:$0xff] }
  0x57   :  { %810 = vmatprep.subr.bf16.mxu0 %v809_v36  ;;  %v831_v16 = vpack.c.bf16 %v142_v13, %v141_v12  ;;  %v833_v17 = vpack.c.bf16 %v160_v15, %v159_v14  ;;  %v143_v18 = vld [vmem:[#allocation5 + $0x260] sm:$0xff]  ;;  %v144_v19 = vld [vmem:[#allocation5 + $0x268] sm:$0xff]  ;;  %v161_v20 = vld [vmem:[#allocation5 + $0x2f0] sm:$0xff] }
  0x58   :  { %808 = vmatpush3.bf16.msra.mxu1 %v807_v35  ;;  %v162_v21 = vld [vmem:[#allocation5 + $0x2f8] sm:$0xff]  ;;  %v835_v22 = vpack.c.bf16 %v144_v19, %v143_v18  ;;  %v145_v24 = vld [vmem:[#allocation5 + $0x270] sm:$0xff]  ;;  %v64_v27 = vld [vmem:[#allocation2 + $0x20] sm:$0xff] }
  0x59   :  { %841 = vmatprep.subr.bf16.mxu1 %v980_v50  ;;  %241 = vmatmul.mubr.f32.vlgmr.msra.gmra.mrb[0].mxu0 %v60_v41  ;;  %v837_v23 = vpack.c.bf16 %v162_v21, %v161_v20  ;;  %v146_v25 = vld [vmem:[#allocation5 + $0x278] sm:$0xff]  ;;  %v457_v28 = vld [vmem:[#allocation7] sm:$0xff]  ;;  %v459_v30 = vld [vmem:[#allocation7 + $0x10] sm:$0xff] }
  0x5a   :  { %812 = vmatpush3.bf16.msra.mxu0 %v811_v42  ;;  %380 = vmatprep.mubr.f32.mxu0 %v65_v49  ;;  %v839_v26 = vpack.c.bf16 %v146_v25, %v145_v24  ;;  %v458_v29 = vld [vmem:[#allocation7 + $0x8] sm:$0xff]  ;;  %v460_v32 = vld [vmem:[#allocation7 + $0x18] sm:$0xff]  ;;  %v461_v34 = vld [vmem:[#allocation7 + $0x20] sm:$0xff] }
  0x5b   :  { %311 = vmatmul.mubr.f32.vlgmr.msra.gmra.mrb[0].mxu1 %v62_v43  ;;  %814 = vmatprep.subr.bf16.mxu0 %v813_v45  ;;  %v845_v31 = vpack.c.bf16 %v458_v29, %v457_v28  ;;  %v848_v33 = vpack.c.bf16 %v460_v32, %v459_v30  ;;  %v462_v35 = vld [vmem:[#allocation7 + $0x28] sm:$0xff]  ;;  %v463_v37 = vld [vmem:[#allocation7 + $0x30] sm:$0xff]  ;;  %v464_v38 = vld [vmem:[#allocation7 + $0x38] sm:$0xff] }
  0x5c   :  { %843 = vmatpush3.bf16.msra.mxu1 %v842_v53  ;;  %707 = vmatprep.mubr.msk.f32.mxu1 %vm981_vm0, %v982_v60  ;;  %v851_v36 = vpack.c.bf16 %v462_v35, %v461_v34  ;;  %v854_v39 = vpack.c.bf16 %v464_v38, %v463_v37  ;;  %v465_v40 = vld [vmem:[#allocation7 + $0x40] sm:$0xff]  ;;  %v466_v41 = vld [vmem:[#allocation7 + $0x48] sm:$0xff]  ;;  %v467_v43 = vld [vmem:[#allocation7 + $0x50] sm:$0xff] }
  0x5d   :  { %844 = vmatprep.subr.bf16.mxu1 %v980_v50  ;;  %v857_v42 = vpack.c.bf16 %v466_v41, %v465_v40  ;;  %v468_v44 = vld [vmem:[#allocation7 + $0x58] sm:$0xff]  ;;  %v469_v46 = vld [vmem:[#allocation7 + $0x60] sm:$0xff]  ;;  %v470_v47 = vld [vmem:[#allocation7 + $0x68] sm:$0xff] }
  0x5e   :  { %816 = vmatpush3.bf16.msra.mxu0 %v815_v54  ;;  %v860_v45 = vpack.c.bf16 %v468_v44, %v467_v43  ;;  %v863_v48 = vpack.c.bf16 %v470_v47, %v469_v46  ;;  %v471_v49 = vld [vmem:[#allocation7 + $0x70] sm:$0xff]  ;;  %v472_v51 = vld [vmem:[#allocation7 + $0x78] sm:$0xff] }
  0x5f   :  { %818 = vmatprep.subr.bf16.mxu0 %v817_v55  ;;  %708 = vmatmul.mubr.msk.f32.vlgmr.msra.gmra.mrb[2].mxu1 %vm172_vm1, %v66_v61  ;;  %v866_v52 = vpack.c.bf16 %v472_v51, %v471_v49  ;;  %v574_v54 = vld [vmem:[%s1085_s2] ss:$0 sm:$0xff]  ;;  %s983_s2 = smov [#allocation8]  }
  0x60   :  { %742 = vmatprep.mubr.msk.f32.mxu1 %vm981_vm0, %v982_v60  ;;  %846 = vmatpush3.bf16.msra.mxu1 %v845_v31  ;;  %s564_s7 = sshll.u32 %s983_s2, 4  ;;  %s565_s7 = int_to_ptr.vmem [resolvable:$true] %s564_s7 }
  0x61   :  { %847 = vmatprep.subr.bf16.mxu1 %v980_v50  ;;  %s947_s8 = scalar_lea.vmem %s565_s7, 128  ;;  %p952_p11 = scmp.lt.s32.totalorder %s565_s7, %s565_s7 }
  0x62   :  { %820 = vmatpush3.bf16.msra.mxu0 %v819_v62  ;;  %p948_p10 = scmp.ne.s32.totalorder %s565_s7, %s947_s8  ;;  %p953_p12 = scmp.lt.s32.totalorder %s947_s8, %s947_s8 }
  0x63   :  { %822 = vmatprep.subr.bf16.mxu0 %v821_v63 }
  0x64   :  { %849 = vmatpush3.bf16.msra.mxu1 %v848_v33  ;;  %p954_p13 = por %p953_p12, %p952_p11 }
  0x65   :  { %850 = vmatprep.subr.bf16.mxu1 %v980_v50 }
  0x66   :  { %824 = vmatpush3.bf16.msra.mxu0 %v823_v4  ;;  %p955_p0 = pnand %p954_p13, %p948_p10 }
  0x67   :  { %826 = vmatprep.subr.bf16.mxu0 %v825_v5  ;;  %v576_v5 = vld [vmem:[%s1087_s4] ss:$0 sm:$0xff] }
  0x68   :  { %852 = vmatpush3.bf16.msra.mxu1 %v851_v36 }
  0x69   :  { %853 = vmatprep.subr.bf16.mxu1 %v980_v50 }
  0x6a   :  { %828 = vmatpush3.bf16.msra.mxu0 %v827_v10 }
  0x6b   :  { %830 = vmatprep.subr.bf16.mxu0 %v829_v11 }
  0x6c   :  { %855 = vmatpush3.bf16.msra.mxu1 %v854_v39 }
  0x6d   :  { %856 = vmatprep.subr.bf16.mxu1 %v980_v50 }
  0x6e   :  { %832 = vmatpush3.bf16.msra.mxu0 %v831_v16 }
  0x6f   :  { %834 = vmatprep.subr.bf16.mxu0 %v833_v17 }
  0x70   :  { %858 = vmatpush3.bf16.msra.mxu1 %v857_v42 }
  0x71   :  { %859 = vmatprep.subr.bf16.mxu1 %v980_v50 }
  0x72   :  { %836 = vmatpush3.bf16.msra.mxu0 %v835_v22 }
  0x73   :  { %838 = vmatprep.subr.bf16.mxu0 %v837_v23 }
  0x74   :  { %861 = vmatpush3.bf16.msra.mxu1 %v860_v45 }
  0x75   :  { %862 = vmatprep.subr.bf16.mxu1 %v980_v50 }
  0x76   :  { %840 = vmatpush3.bf16.msra.mxu0 %v839_v26 }
  0x78   :  { %864 = vmatpush3.bf16.msra.mxu1 %v863_v48 }
  0x79   :  { %381 = vmatmul.mubr.f32.vlgmr.msra.gmra.mrb[2].mxu0 %v64_v27  ;;  %865 = vmatprep.subr.bf16.mxu1 %v980_v50 }
  0x7c   :  { %867 = vmatpush3.bf16.msra.mxu1 %v866_v52 }
 0x12c   :  { %v610_v53 = vpop.f32.mrb[0].mxu0 }
 0x12d   :  { %v611_v55 = vpop.f32.mrb[1].mxu0 }
 0x12e   :  { %v645_v56 = vpop.f32.mrb[0].mxu1  ;;  %v612_v57 = vadd.f32 %v611_v55, %v610_v53 }
 0x12f   :  { %v646_v58 = vpop.f32.mrb[1].mxu1 }
 0x130   :  { %v647_v59 = vadd.f32 %v646_v58, %v645_v56  ;;  %v243_v60 = vadd.f32 %v612_v57, %v574_v54 }
 0x132   :  { %v313_v61 = vadd.f32 %v647_v59, %v243_v60  ;;  %v452_v62 = vpop.f32.mrb[2].mxu1 }
 0x133   :  { %v709_v63 = vpop.f32.mrb[3].mxu1 }
 0x14c   :  { %v680_v0 = vpop.f32.mrb[2].mxu0 }
 0x14d   :  { %v681_v50 = vpop.f32.mrb[3].mxu0 }
 0x14e   :  { %v682_v1 = vadd.f32 %v681_v50, %v680_v0 }
 0x150   :  { %v383_v2 = vadd.f32 %v682_v1, %v313_v61 }
 0x152   :  { %v453_v3 = vadd.f32 %v452_v62, %v383_v2 }
 0x154   :  { %v456_v4 = vmax.f32 %v453_v3, 0.0 }
 0x156   :  { %743 = vmatmul.mubr.f32.vlgmr.msra.gmra.mrb[4].mxu1 %v456_v4 }
 0x229   :  { %v546_v6 = vpop.f32.mrb[4].mxu1 }
 0x22a   :  { %v547_v7 = vadd.f32 %v576_v5, %v546_v6  ;;  %v744_v8 = vpop.f32.mrb[5].mxu1 }
 0x22c   :  { %v577_v9 = vmul.f32 -1.442695, %v547_v7 }
 0x22e   :  { %877 = vpow2.f32 %v577_v9 }
 0x238   :  { %v878_v10 = vpop.eup %877 }
 0x239   :  { %v553_v11 = vadd.f32 1.0, %v878_v10 }
 0x23b   :  { %879 = vrcp.f32 %v553_v11 }
 0x245   :  { %v880_v12 = vpop.eup %879 }
 0x246   :  { %557 = vst.msk [vmem:[#allocation8] sm:$0xff] %vm556_vm2, %v880_v12 }
 0x247   :  { %958 = shalt.err (!%p955_p0)
}
 0x248   :  { %s959_s10 = scalar_lea.hbm %s1088_s5, 128 }
 0x249   :  { %p960_p1 = scmp.ne.s32.totalorder %s1088_s5, %s959_s10  ;;  %p963_p2 = scmp.lt.u32.totalorder %s959_s10, %s1088_s5 }
 0x24b   :  { %p965_p3 = pnand %p963_p2, %p960_p1 }
 0x24d   :  { %968 = shalt.err (!%p965_p3)
}
 0x24e   :  { %567 = dma.vmem_to_hbm [thread:$0]  %s565_s7, 128, %s1088_s5, [#allocation4]  }
 0x24f   :  { %973 = dma.done.wait [#allocation4], 128  }
 0x250   :  { %974 = vsyncadd [#allocation4], 4294967168 }
 0x251   :  { %571 = vsyncpa [#allocation3], 1 }
 0x252   :  { %572 = vsyncpa [#allocation6], 1 }
 0x253   :  { %573 = vsyncpa [#allocation4], 1 }

</bundles_post_ra>
